<compile_context>
chip_gen: v5e
topology: v5e:2x2
jax: 0.10.0
libtpu: 0.0.40
codegen_flags: <defaults>
</compile_context>

<pallas_src>
import jax
import jax.numpy as jnp
from jax.experimental import pallas as pl
from jax.experimental.pallas import tpu as pltpu


def titanic_kernel(x_ref, w1_ref, b1_ref, w2_ref, b2_ref, w3_ref, b3_ref, o_ref):
    # x_ref: (in_features, BLOCK_N) -- batch on lanes.
    x = x_ref[...]

    # l1 -> relu        (BN1 folded into l2)
    h1 = jnp.dot(w1_ref[...], x, preferred_element_type=jnp.float32) + b1_ref[...]
    h1 = jnp.maximum(h1, 0.0)

    # l2 (BN1-folded) -> leaky_relu(0.01)   (BN2 folded into l3)
    h2 = jnp.dot(w2_ref[...], h1, preferred_element_type=jnp.float32) + b2_ref[...]
    h2 = jnp.where(h2 >= 0.0, h2, 0.01 * h2)

    # l3 (BN2-folded) -> sigmoid
    h3 = jnp.dot(w3_ref[...], h2, preferred_element_type=jnp.float32) + b3_ref[...]
    o_ref[...] = jax.nn.sigmoid(h3).astype(o_ref.dtype)


def _round_up(a, m):
    return ((a + m - 1) // m) * m


def titanic_forward(x, params, *, block_n=2048):
    """x: (N, in_features) float32. Returns (N, 1) float32 (eval-mode forward)."""
    n, in_features = x.shape
    eps = 1e-5
    f32 = jnp.float32

    # --- Fold BatchNorm (eval) into the next linear layer (plain JAX glue). ---
    s1 = params["bn1_gamma"] / jnp.sqrt(params["bn1_var"] + eps)
    sh1 = params["bn1_beta"] - params["bn1_mean"] * s1
    s2 = params["bn2_gamma"] / jnp.sqrt(params["bn2_var"] + eps)
    sh2 = params["bn2_beta"] - params["bn2_mean"] * s2

    w2f = params["w2"] * s1[:, None]          # (32, 16)
    b2f = params["b2"] + sh1 @ params["w2"]   # (16,)
    w3f = params["w3"] * s2[:, None]          # (16, 1)
    b3f = params["b3"] + sh2 @ params["w3"]   # (1,)

    # --- Feature-major layout: weights transposed, biases as column vectors. ---
    w1t = params["w1"].T.astype(f32)          # (32, in_features)
    b1c = params["b1"].reshape(-1, 1).astype(f32)   # (32, 1)
    w2t = w2f.T.astype(f32)                   # (16, 32)
    b2c = b2f.reshape(-1, 1).astype(f32)      # (16, 1)
    w3t = w3f.T.astype(f32)                   # (1, 16)
    b3c = b3f.reshape(-1, 1).astype(f32)      # (1, 1)

    # --- Pad the batch to a lane-aligned multiple of the block size. ---
    n_pad = _round_up(n, 128)
    if n_pad <= block_n:
        block_n = n_pad
    else:
        n_pad = _round_up(n_pad, block_n)

    xt = jnp.pad(x.T.astype(f32), ((0, 0), (0, n_pad - n)))   # (in_features, n_pad)

    grid = (n_pad // block_n,)

    out = pl.pallas_call(
        titanic_kernel,
        out_shape=jax.ShapeDtypeStruct((1, n_pad), f32),
        grid=grid,
        in_specs=[
            # Streamed input: batch tile on lanes.
            pl.BlockSpec((in_features, block_n), lambda i: (0, i)),
            # Resident weights / biases (full-array blocks, same tile every step).
            pl.BlockSpec(w1t.shape, lambda i: (0, 0)),
            pl.BlockSpec(b1c.shape, lambda i: (0, 0)),
            pl.BlockSpec(w2t.shape, lambda i: (0, 0)),
            pl.BlockSpec(b2c.shape, lambda i: (0, 0)),
            pl.BlockSpec(w3t.shape, lambda i: (0, 0)),
            pl.BlockSpec(b3c.shape, lambda i: (0, 0)),
        ],
        out_specs=pl.BlockSpec((1, block_n), lambda i: (0, i)),
        compiler_params=pltpu.CompilerParams(
            dimension_semantics=("parallel",)),
    )(xt, w1t, b1c, w2t, b2c, w3t, b3c)

    # Drop padding, return (N, 1) row-major like the PyTorch module.
    return out[:, :n].T


def titanic_reference(x, params):
    """Pure-JAX eval-mode reference (mirrors the PyTorch forward)."""
    eps = 1e-5
    h1 = jnp.maximum(x @ params["w1"] + params["b1"], 0.0)
    h1 = (h1 - params["bn1_mean"]) / jnp.sqrt(params["bn1_var"] + eps) \
         * params["bn1_gamma"] + params["bn1_beta"]
    h2 = h1 @ params["w2"] + params["b2"]
    h2 = jnp.where(h2 >= 0.0, h2, 0.01 * h2)
    h2 = (h2 - params["bn2_mean"]) / jnp.sqrt(params["bn2_var"] + eps) \
         * params["bn2_gamma"] + params["bn2_beta"]
    return jax.nn.sigmoid(h2 @ params["w3"] + params["b3"])


def init_params(key, input_size=8):
    ks = jax.random.split(key, 14)

    def lin(kw, kb, fan_in, fan_out):
        bound = 1.0 / jnp.sqrt(fan_in)
        w = jax.random.uniform(kw, (fan_in, fan_out), jnp.float32, -bound, bound)
        b = jax.random.uniform(kb, (fan_out,), jnp.float32, -bound, bound)
        return w, b

    w1, b1 = lin(ks[0], ks[1], input_size, 32)
    w2, b2 = lin(ks[2], ks[3], 32, 16)
    w3, b3 = lin(ks[4], ks[5], 16, 1)

    # Non-trivial BN running stats / affine so the folding path is exercised.
    return {
        "w1": w1, "b1": b1,
        "w2": w2, "b2": b2,
        "w3": w3, "b3": b3,
        "bn1_gamma": jax.random.uniform(ks[6], (32,), jnp.float32, 0.5, 1.5),
        "bn1_beta": jax.random.normal(ks[7], (32,), jnp.float32) * 0.1,
        "bn1_mean": jax.random.normal(ks[8], (32,), jnp.float32) * 0.1,
        "bn1_var": jax.random.uniform(ks[9], (32,), jnp.float32, 0.5, 1.5),
        "bn2_gamma": jax.random.uniform(ks[10], (16,), jnp.float32, 0.5, 1.5),
        "bn2_beta": jax.random.normal(ks[11], (16,), jnp.float32) * 0.1,
        "bn2_mean": jax.random.normal(ks[12], (16,), jnp.float32) * 0.1,
        "bn2_var": jax.random.uniform(ks[13], (16,), jnp.float32, 0.5, 1.5),
    }


if __name__ == "__main__":
    key = jax.random.PRNGKey(0)
    kx, kp = jax.random.split(key)

    batch = 10          # small, non-multiple-of-128 -> exercises the padding path
    input_size = 8
    x = jax.random.normal(kx, (batch, input_size), jnp.float32)
    params = init_params(kp, input_size)

    out = titanic_forward(x, params)
    out = jax.block_until_ready(out)

    # Correctness: shape, sigmoid range, and match against pure-JAX reference.
    assert out.shape == (batch, 1)
    assert bool(jnp.all((out >= 0.0) & (out <= 1.0)))
    ref = titanic_reference(x, params)
    assert bool(jnp.allclose(out, ref, rtol=1e-5, atol=1e-5)), \
        f"max abs err {float(jnp.max(jnp.abs(out - ref)))}"

    print("KERNEL_OK")
</pallas_src>

<mosaic_0001>
module attributes {stable_mosaic.version = 11 : i64} {
  func.func @titanic_kernel(%arg0: i32, %arg1: memref<8x128xf32, #tpu.memory_space<vmem>>, %arg2: memref<32x8xf32, #tpu.memory_space<vmem>>, %arg3: memref<32x1xf32, #tpu.memory_space<vmem>>, %arg4: memref<16x32xf32, #tpu.memory_space<vmem>>, %arg5: memref<16x1xf32, #tpu.memory_space<vmem>>, %arg6: memref<1x16xf32, #tpu.memory_space<vmem>>, %arg7: memref<1x1xf32, #tpu.memory_space<vmem>>, %arg8: memref<1x128xf32, #tpu.memory_space<vmem>>) attributes {dimension_semantics = [#tpu.dimension_semantics<parallel>], iteration_bounds = array<i64: 1>, scalar_prefetch = 0 : i64, scratch_operands = 0 : i64, tpu.core_type = #tpu.core_type<tc>, window_params = [{transform_indices = @transform_0, window_bounds = array<i64: 8, 128>}, {pipeline_mode = #tpu.pipeline_mode<synchronous>, transform_indices = @transform_1, window_bounds = array<i64: 32, 8>}, {pipeline_mode = #tpu.pipeline_mode<synchronous>, transform_indices = @transform_2, window_bounds = array<i64: 32, 1>}, {pipeline_mode = #tpu.pipeline_mode<synchronous>, transform_indices = @transform_3, window_bounds = array<i64: 16, 32>}, {pipeline_mode = #tpu.pipeline_mode<synchronous>, transform_indices = @transform_4, window_bounds = array<i64: 16, 1>}, {pipeline_mode = #tpu.pipeline_mode<synchronous>, transform_indices = @transform_5, window_bounds = array<i64: 1, 16>}, {pipeline_mode = #tpu.pipeline_mode<synchronous>, transform_indices = @transform_6, window_bounds = array<i64: 1, 1>}, {transform_indices = @transform_7, window_bounds = array<i64: 1, 128>}]} {
    %c0 = arith.constant 0 : index
    %c0_0 = arith.constant 0 : index
    %0 = vector.load %arg1[%c0, %c0_0] : memref<8x128xf32, #tpu.memory_space<vmem>>, vector<8x128xf32>
    %c0_1 = arith.constant 0 : index
    %c0_2 = arith.constant 0 : index
    %1 = vector.load %arg2[%c0_1, %c0_2] : memref<32x8xf32, #tpu.memory_space<vmem>>, vector<32x8xf32>
    %cst = arith.constant dense<0.000000e+00> : vector<32x128xf32>
    %2 = tpu.matmul %1, %0, %cst {dimension_numbers = #tpu.dot_dimension_numbers<[1], [0], [0], [1], [0, 0, 1, 1], [], []>} : vector<32x8xf32>, vector<8x128xf32>, vector<32x128xf32> -> vector<32x128xf32>
    %c0_3 = arith.constant 0 : index
    %c0_4 = arith.constant 0 : index
    %3 = vector.load %arg3[%c0_3, %c0_4] : memref<32x1xf32, #tpu.memory_space<vmem>>, vector<32x1xf32>
    %4 = vector.broadcast %3 : vector<32x1xf32> to vector<32x128xf32>
    %5 = arith.addf %2, %4 : vector<32x128xf32>
    %cst_5 = arith.constant 0.000000e+00 : f32
    %6 = vector.broadcast %cst_5 : f32 to vector<32x128xf32>
    %7 = arith.maximumf %5, %6 : vector<32x128xf32>
    %c0_6 = arith.constant 0 : index
    %c0_7 = arith.constant 0 : index
    %8 = vector.load %arg4[%c0_6, %c0_7] : memref<16x32xf32, #tpu.memory_space<vmem>>, vector<16x32xf32>
    %cst_8 = arith.constant dense<0.000000e+00> : vector<16x128xf32>
    %9 = tpu.matmul %8, %7, %cst_8 {dimension_numbers = #tpu.dot_dimension_numbers<[1], [0], [0], [1], [0, 0, 1, 1], [], []>} : vector<16x32xf32>, vector<32x128xf32>, vector<16x128xf32> -> vector<16x128xf32>
    %c0_9 = arith.constant 0 : index
    %c0_10 = arith.constant 0 : index
    %10 = vector.load %arg5[%c0_9, %c0_10] : memref<16x1xf32, #tpu.memory_space<vmem>>, vector<16x1xf32>
    %11 = vector.broadcast %10 : vector<16x1xf32> to vector<16x128xf32>
    %12 = arith.addf %9, %11 : vector<16x128xf32>
    %cst_11 = arith.constant 0.000000e+00 : f32
    %13 = vector.broadcast %cst_11 : f32 to vector<16x128xf32>
    %14 = arith.cmpf oge, %12, %13 : vector<16x128xf32>
    %cst_12 = arith.constant 0.00999999977 : f32
    %15 = vector.broadcast %cst_12 : f32 to vector<16x128xf32>
    %16 = arith.mulf %15, %12 : vector<16x128xf32>
    %17 = arith.select %14, %12, %16 : vector<16x128xi1>, vector<16x128xf32>
    %c0_13 = arith.constant 0 : index
    %c0_14 = arith.constant 0 : index
    %18 = vector.load %arg6[%c0_13, %c0_14] : memref<1x16xf32, #tpu.memory_space<vmem>>, vector<1x16xf32>
    %cst_15 = arith.constant dense<0.000000e+00> : vector<1x128xf32>
    %19 = tpu.matmul %18, %17, %cst_15 {dimension_numbers = #tpu.dot_dimension_numbers<[1], [0], [0], [1], [0, 0, 1, 1], [], []>} : vector<1x16xf32>, vector<16x128xf32>, vector<1x128xf32> -> vector<1x128xf32>
    %c0_16 = arith.constant 0 : index
    %c0_17 = arith.constant 0 : index
    %20 = vector.load %arg7[%c0_16, %c0_17] : memref<1x1xf32, #tpu.memory_space<vmem>>, vector<1x1xf32>
    %21 = vector.broadcast %20 : vector<1x1xf32> to vector<1x128xf32>
    %22 = arith.addf %19, %21 : vector<1x128xf32>
    %23 = arith.negf %22 : vector<1x128xf32>
    %24 = math.exp %23 : vector<1x128xf32>
    %cst_18 = arith.constant 1.000000e+00 : f32
    %25 = vector.broadcast %cst_18 : f32 to vector<1x128xf32>
    %26 = arith.addf %25, %24 : vector<1x128xf32>
    %27 = arith.divf %25, %26 : vector<1x128xf32>
    %c0_19 = arith.constant 0 : index
    %c0_20 = arith.constant 0 : index
    %28 = vector.load %arg8[%c0_19, %c0_20] : memref<1x128xf32, #tpu.memory_space<vmem>>, vector<1x128xf32>
    tpu.vector_store %arg8[%c0_19, %c0_20], %27 {strides = array<i32>} : memref<1x128xf32, #tpu.memory_space<vmem>>, vector<1x128xf32>,
    return
  }
  func.func @transform_0(%arg0: i32) -> (i32, i32) {
    %c0_i32 = arith.constant 0 : i32
    %c0_i32_0 = arith.constant 0 : i32
    return %c0_i32, %arg0 : i32, i32
  }
  func.func @transform_1(%arg0: i32) -> (i32, i32) {
    %c0_i32 = arith.constant 0 : i32
    %c0_i32_0 = arith.constant 0 : i32
    %c0_i32_1 = arith.constant 0 : i32
    return %c0_i32, %c0_i32_0 : i32, i32
  }
  func.func @transform_2(%arg0: i32) -> (i32, i32) {
    %c0_i32 = arith.constant 0 : i32
    %c0_i32_0 = arith.constant 0 : i32
    %c0_i32_1 = arith.constant 0 : i32
    return %c0_i32, %c0_i32_0 : i32, i32
  }
  func.func @transform_3(%arg0: i32) -> (i32, i32) {
    %c0_i32 = arith.constant 0 : i32
    %c0_i32_0 = arith.constant 0 : i32
    %c0_i32_1 = arith.constant 0 : i32
    return %c0_i32, %c0_i32_0 : i32, i32
  }
  func.func @transform_4(%arg0: i32) -> (i32, i32) {
    %c0_i32 = arith.constant 0 : i32
    %c0_i32_0 = arith.constant 0 : i32
    %c0_i32_1 = arith.constant 0 : i32
    return %c0_i32, %c0_i32_0 : i32, i32
  }
  func.func @transform_5(%arg0: i32) -> (i32, i32) {
    %c0_i32 = arith.constant 0 : i32
    %c0_i32_0 = arith.constant 0 : i32
    %c0_i32_1 = arith.constant 0 : i32
    return %c0_i32, %c0_i32_0 : i32, i32
  }
  func.func @transform_6(%arg0: i32) -> (i32, i32) {
    %c0_i32 = arith.constant 0 : i32
    %c0_i32_0 = arith.constant 0 : i32
    %c0_i32_1 = arith.constant 0 : i32
    return %c0_i32, %c0_i32_0 : i32, i32
  }
  func.func @transform_7(%arg0: i32) -> (i32, i32) {
    %c0_i32 = arith.constant 0 : i32
    %c0_i32_0 = arith.constant 0 : i32
    return %c0_i32, %arg0 : i32, i32
  }
}

</mosaic_0001>

<bundles_post_ra>
// kernel: tpu_custom_call.1
= control target key start
LH: loop header
LB: loop body
LE: loop exit
PB: predicated region body
PF: predicated region fallthrough
CT: control target
= control target key end

     0   :  { %s360_s0 = inlined_call_operand.vmem [shape: f32[8,128], index: 0, kind: input, shape index: {}]   ;;  %s361_s1 = inlined_call_operand.vmem [shape: f32[32,8], index: 1, kind: input, shape index: {}]   ;;  %s362_s2 = inlined_call_operand.vmem [shape: f32[32,1], index: 2, kind: input, shape index: {}]   ;;  %s363_s3 = inlined_call_operand.vmem [shape: f32[16,32], index: 3, kind: input, shape index: {}]   ;;  %s364_s4 = inlined_call_operand.vmem [shape: f32[16,1], index: 4, kind: input, shape index: {}]   ;;  %s365_s5 = inlined_call_operand.vmem [shape: f32[1,16], index: 5, kind: input, shape index: {}]   ;;  %s366_s6 = inlined_call_operand.<no memory space> [shape: f32[1,1], index: 6, kind: input, shape index: {}]   ;;  %s367_s7 = inlined_call_operand.hbm [shape: f32[1,128], index: 7, kind: output, shape index: {}]  }
   0x1   :  { %v12_v0 = vstv %s366_s6 }
   0x2   :  { %13 = vst [vmem:[#allocation2] sm:$0x1] %v12_v0 }
   0x3   :  { %v29_v1 = vld [vmem:[%s360_s0] sm:$0xff]  ;;  %v32_v2 = vld [vmem:[%s361_s1 + $0x10] sm:$0xff]  ;;  %vm58_vm0 = vcmask 64512   ;;  %v37_v3 = vld [vmem:[%s362_s2 + $0x18] sm:$0xff]  ;;  %v266_v4 = vmov 0  }
   0x4   :  { %230 = vmatpush.msra.mxu3 %v29_v1  ;;  %233 = vset.pattern.permute.xlu0 %v266_v4  ;;  %v30_v5 = vld [vmem:[%s361_s1] sm:$0xff]  ;;  %v35_v6 = vld [vmem:[%s362_s2 + $0x8] sm:$0xff] }
   0x5   :  { %224 = vmatmul.msk.f32.vlgmr.msra.gmra.mxu3 %vm58_vm0, %v32_v2  ;;  %55 = vperm.xlu0 %233, %v37_v3  }
   0x6   :  { %86 = vmatpush.msra.mxu0 %v29_v1  ;;  %234 = vset.pattern.permute.xlu1 %v266_v4 }
   0x7   :  { %14 = vsyncpa [#allocation4], 0  ;;  %222 = vmatmul.msk.f32.vlgmr.msra.gmra.mxu0 %vm58_vm0, %v30_v5  ;;  %45 = vperm.xlu1 %234, %v35_v6   ;;  %v33_v7 = vld [vmem:[%s361_s1 + $0x18] sm:$0xff]  ;;  %v36_v8 = vld [vmem:[%s362_s2 + $0x10] sm:$0xff]  ;;  %vm118_vm1 = vcmask 261120   ;;  %vm162_vm4 = vcmask 130048  }
   0x8   :  { %235 = vset.pattern.permute.xlu2 %v266_v4  ;;  %v31_v9 = vld [vmem:[%s361_s1 + $0x8] sm:$0xff]  ;;  %v34_v10 = vld [vmem:[%s362_s2] sm:$0xff]  ;;  %s213_s28 = sshll.u32 %s367_s7, 4  ;;  %s214_s28 = int_to_ptr.hbm [resolvable:$true] %s213_s28 }
   0x9   :  { %v155_v11 = vld [vmem:[#allocation2] sm:$0x1]  ;;  %v107_v12 = vld [vmem:[%s364_s4 + $0x8] sm:$0xff] }
   0xa   :  { %115 = vperm.xlu2 %235, %v107_v12   ;;  %v106_v17 = vld [vmem:[%s364_s4] sm:$0xff]  ;;  %v105_v31 = vld [vmem:[%s363_s3 + $0x8] sm:$0xff] }
   0xb   :  { %v104_v30 = vld [vmem:[%s363_s3] sm:$0xff]  ;;  %s267_s3 = smov [#allocation3]  }
   0xc   :  { %v154_v41 = vld [vmem:[%s365_s5] sm:$0x1]  ;;  %s211_s5 = sshll.u32 %s267_s3, 4  ;;  %s212_s5 = int_to_ptr.vmem [resolvable:$true] %s211_s5 }
   0xd   :  { %225 = vmatmul.msk.f32.gmra.mxu3 %vm58_vm0, %v33_v7  ;;  %50 = vperm.xlu0 %233, %v36_v8  }
   0xf   :  { %223 = vmatmul.msk.f32.gmra.mxu0 %vm58_vm0, %v31_v9  ;;  %40 = vperm.xlu1 %234, %v34_v10  }
  0x12   :  { %110 = vperm.xlu2 %235, %v106_v17  }
  0x15   :  { %158 = vperm.xlu0 %233, %v155_v11  }
  0x64   :  { %v116_v32 = vpop.permute.xlu2 %115 }
  0x6c   :  { %v111_v34 = vpop.permute.xlu2 %110 }
  0x77   :  { %v56_v13 = vpop.permute.xlu0 %55 }
  0x79   :  { %v46_v15 = vpop.permute.xlu1 %45 }
  0x7f   :  { %v51_v18 = vpop.permute.xlu0 %50 }
  0x81   :  { %v41_v23 = vpop.permute.xlu1 %40 }
  0x84   :  { %v88_v14 = vpop.f32.mrf.mxu0 }
  0x85   :  { %v89_v27 = vadd.f32 %v88_v14, %v41_v23 }
  0x87   :  { %v100_v29 = vmax.f32 %v89_v27, 0.0  ;;  %v159_v43 = vpop.permute.xlu0 %158 }
  0x88   :  { %v94_v16 = vpop.f32.mrf.mxu3  ;;  %v161_v44 = vperm.slane %v159_v43, 0 }
  0x89   :  { %v95_v21 = vadd.f32 %v94_v16, %v51_v18 }
  0x8b   :  { %v102_v26 = vmax.f32 %v95_v21, 0.0 }
  0x8c   :  { %v91_v19 = vpop.f32.mrf.mxu0 }
  0x8d   :  { %v92_v24 = vadd.f32 %v91_v19, %v46_v15 }
  0x8f   :  { %v101_v28 = vmax.f32 %v92_v24, 0.0 }
  0x90   :  { %v97_v20 = vpop.f32.mrf.mxu3 }
  0x91   :  { %v98_v22 = vadd.f32 %v97_v20, %v56_v13 }
  0x93   :  { %v103_v25 = vmax.f32 %v98_v22, 0.0 }
  0x95   :  { %137 = vmatpush.msra.mxu1 %v103_v25 }
  0x97   :  { %138 = vmatpush.msra.mxu1 %v102_v26 }
  0x99   :  { %139 = vmatpush.msra.mxu1 %v101_v28 }
  0x9b   :  { %140 = vmatpush.msra.mxu1 %v100_v29 }
  0x9c   :  { %226 = vmatmul.msk.f32.vlgmr.msra.gmra.mxu1 %vm118_vm1, %v104_v30 }
  0xa4   :  { %227 = vmatmul.msk.f32.gmra.mxu1 %vm118_vm1, %v105_v31 }
 0x119   :  { %v142_v33 = vpop.f32.mrf.mxu1 }
 0x11a   :  { %v143_v35 = vadd.f32 %v142_v33, %v111_v34 }
 0x11c   :  { %v150_v39 = vmul.f32 0.01, %v143_v35  ;;  %vm148_vm3 = vcmp.ge.f32.partialorder %v143_v35, 0.0 }
 0x11e   :  { %v152_v42 = vsel %vm148_vm3, %v143_v35, %v150_v39 }
 0x121   :  { %v145_v36 = vpop.f32.mrf.mxu1 }
 0x122   :  { %v146_v37 = vadd.f32 %v145_v36, %v116_v32 }
 0x124   :  { %vm149_vm2 = vcmp.ge.f32.partialorder %v146_v37, 0.0  ;;  %v151_v38 = vmul.f32 0.01, %v146_v37 }
 0x126   :  { %v153_v40 = vsel %vm149_vm2, %v146_v37, %v151_v38 }
 0x127   :  { %180 = vmatpush.msra.mxu2 %v153_v40 }
 0x129   :  { %181 = vmatpush.msra.mxu2 %v152_v42 }
 0x12a   :  { %228 = vmatmul.msk.f32.vlgmr.msra.gmra.mxu2 %vm162_vm4, %v154_v41 }
 0x1ad   :  { %v183_v45 = vpop.f32.mrf.mxu2 }
 0x1ae   :  { %v184_v46 = vadd.f32 %v183_v45, %v161_v44 }
 0x1b0   :  { %v229_v47 = vmul.f32 -1.442695, %v184_v46 }
 0x1b2   :  { %236 = vpow2.f32 %v229_v47 }
 0x1b8   :  { %v237_v48 = vpop.eup %236 }
 0x1b9   :  { %v189_v49 = vadd.f32 1.0, %v237_v48 }
 0x1bb   :  { %238 = vrcp.f32 %v189_v49  ;;  %v201_v53 = vand.u32 2147483648, %v189_v49  ;;  %v199_v55 = vand.u32 2147483647, %v189_v49  ;;  %vm195_vm6 = vweird.f32 %v189_v49 }
 0x1bd   :  { %v202_v57 = vor.u32 1.1754944e-38, %v201_v53  ;;  %vm200_vm8 = vcmp.eq.f32.partialorder %v199_v55, 8.507059e+37 }
 0x1c1   :  { %v239_v50 = vpop.eup %238 }
 0x1c2   :  { %v191_v51 = vmul.f32 %v239_v50, %v189_v49  ;;  %vm196_vm5 = vweird.f32 %v239_v50 }
 0x1c3   :  { %vm197_vm7 = vmor %vm195_vm6, %vm196_vm5 }
 0x1c4   :  { %v192_v52 = vsub.f32 1.0, %v191_v51 }
 0x1c6   :  { %v193_v54 = vmul.f32 %v239_v50, %v192_v52 }
 0x1c8   :  { %v194_v56 = vadd.f32 %v239_v50, %v193_v54 }
 0x1ca   :  { %v198_v58 = vsel %vm197_vm7, %v239_v50, %v194_v56 }
 0x1cb   :  { %v203_v59 = vsel %vm200_vm8, %v202_v57, %v198_v58 }
 0x1cc   :  { %205 = vst [vmem:[#allocation3] sm:$0x1] %v203_v59 }
 0x1cd   :  { %216 = dma.vmem_to_hbm [thread:$0]  %s212_s5, 16, %s214_s28, [#allocation4]  }
 0x1ce   :  { %264 = dma.done.wait [#allocation4], 16  }
 0x1cf   :  { %265 = vsyncadd [#allocation4], 4294967280 }
 0x1d0   :  { %221 = vsyncpa [#allocation4], 1 }

</bundles_post_ra>
